<compile_context>
chip_gen: v7x
topology: tpu7x:2x2x1
jax: 0.10.0
libtpu: 0.0.40
codegen_flags: <defaults>
</compile_context>

<pallas_src>
import jax
import jax.numpy as jnp
import numpy as np
from jax.experimental import pallas as pl
from jax.experimental.pallas import tpu as pltpu

IMG_FEAT = 2048   # se_resnext-style backbone feature dim (img_fc: 2048 -> 256)
FC_DIM   = 256
VIS_FEAT = 256    # DPN26 visit branch output dim (so cat(img, vis) -> 512)
NUM_CLS  = 9
CLS_PAD  = 128    # lane-dense padded class dim; wrapper slices [:, :NUM_CLS]
MAX_BT   = 256    # batch tile (weights stay resident, activations stream)

_HI = jax.lax.Precision.HIGHEST


def multimodal_kernel(x_img_ref, x_vis_ref,
                      w_img_head_ref, w_vis_head_ref, b_head_ref,
                      out_ref):
    # ---------------- image branch ----------------
    # TODO(synk): img_encoder (se_resnext101_32x4d / densenet / ...) is an
    # external module not defined in multimodal.py; stand-in = global average
    # pool + linear projection, folded (with img_fc and cls) at trace time.
    x_img = x_img_ref[...]                                        # (bt, C_img, H*W)
    gap_img = jnp.sum(x_img, axis=-1) * (1.0 / x_img.shape[-1])   # (bt, C_img)

    # nn.Dropout(0.5) is identity in eval mode (required for the fold).
    # TODO(synk): training-mode dropout (random mask, x2 scale) not implemented.

    # ---------------- visit branch ----------------
    # TODO(synk): visit_model (DPN26) is an external module; stand-in = global
    # average pool + linear projection, folded with the cls head at trace time.
    x_vis = x_vis_ref[...]                                        # (bt, C_vis, T*H)
    gap_vis = jnp.sum(x_vis, axis=-1) * (1.0 / x_vis.shape[-1])   # (bt, C_vis)

    # ---------------- fully-folded head ----------------
    # concat -> img_fc -> cls all folded into (C, 128) lane-dense weights.
    logits = (jnp.dot(gap_img, w_img_head_ref[...], preferred_element_type=jnp.float32)
              + jnp.dot(gap_vis, w_vis_head_ref[...], preferred_element_type=jnp.float32)
              + b_head_ref[...])                                  # (bt, 128) lane-dense
    out_ref[...] = logits


def _pick_batch_tile(B):
    """Batch tile: full batch for tiny B; otherwise >=2 grid steps, capped at MAX_BT."""
    if B <= 8:
        return B                      # block equals full batch dim (tiling rule ok)
    half = pl.cdiv(B, 2)
    bt = ((half + 7) // 8) * 8        # multiple of 8 for sublane tiling
    return min(MAX_BT, bt)


def multimodal_forward(x_img, x_vis, params):
    B, C_img, H, W = x_img.shape
    Bv, C_vis, T, Hv = x_vis.shape
    assert B == Bv

    # flatten spatial dims onto the lane axis
    x_img_f = x_img.reshape(B, C_img, H * W)
    x_vis_f = x_vis.reshape(B, C_vis, T * Hv)

    # ---- trace-time weight folding (eval mode: dropout == identity) ----
    w_cls_img = params["w_cls"][:FC_DIM]                           # (256, 9)
    w_cls_vis = params["w_cls"][FC_DIM:]                           # (256, 9)

    w_img_fc = jnp.dot(params["w_enc"], params["w_fc"], precision=_HI)                 # (C_img, 256)
    b_img_fc = jnp.dot(params["b_enc"], params["w_fc"], precision=_HI) + params["b_fc"]  # (256,)

    w_img_head = jnp.dot(w_img_fc, w_cls_img, precision=_HI)       # (C_img, 9)
    w_vis_head = jnp.dot(params["w_vis"], w_cls_vis, precision=_HI)  # (C_vis, 9)
    b_head = (jnp.dot(b_img_fc, w_cls_img, precision=_HI)
              + jnp.dot(params["b_vis"], w_cls_vis, precision=_HI)
              + params["b_cls"])                                   # (9,)

    # ---- lane-pad the tiny folded head to 128 columns (few KB, lane-dense store) ----
    pad_cols = ((0, 0), (0, CLS_PAD - NUM_CLS))
    w_img_head = jnp.pad(w_img_head, pad_cols)                     # (C_img, 128)
    w_vis_head = jnp.pad(w_vis_head, pad_cols)                     # (C_vis, 128)
    b_head = jnp.pad(b_head, (0, CLS_PAD - NUM_CLS)).reshape(1, CLS_PAD)

    weights = (w_img_head, w_vis_head, b_head)

    bt = _pick_batch_tile(B)
    grid = (pl.cdiv(B, bt),)

    act_specs = [
        pl.BlockSpec((bt, C_img, H * W), lambda i: (i, 0, 0)),
        pl.BlockSpec((bt, C_vis, T * Hv), lambda i: (i, 0, 0)),
    ]
    # weights: same block every grid step -> stay VMEM-resident across batch tiles
    w_specs = [pl.BlockSpec(w.shape, lambda i: (0, 0)) for w in weights]
    out_spec = pl.BlockSpec((bt, CLS_PAD), lambda i: (i, 0))

    flops = (2 * B * (C_img + C_vis) * CLS_PAD
             + B * (C_img * H * W + C_vis * T * Hv))
    bytes_accessed = 4 * (x_img_f.size + x_vis_f.size + B * CLS_PAD
                          + sum(int(w.size) for w in weights))

    out_padded = pl.pallas_call(
        multimodal_kernel,
        out_shape=jax.ShapeDtypeStruct((B, CLS_PAD), jnp.float32),
        grid=grid,
        in_specs=act_specs + w_specs,
        out_specs=out_spec,
        compiler_params=pltpu.CompilerParams(
            dimension_semantics=("parallel",),          # megacore sharding on v7x
            vmem_limit_bytes=32 * 1024 * 1024),         # bt=256 working set ~14 MB
        cost_estimate=pl.CostEstimate(
            flops=flops, transcendentals=0, bytes_accessed=bytes_accessed),
    )(x_img_f, x_vis_f, *weights)

    return out_padded[:, :NUM_CLS]


def multimodal_reference(x_img, x_vis, params):
    """Pure-JAX reference (unfused), high-precision matmuls."""
    B, C_img, H, W = x_img.shape
    _, C_vis, T, Hv = x_vis.shape
    gap_img = jnp.mean(x_img.reshape(B, C_img, H * W), axis=-1)
    feat_img = jnp.dot(gap_img, params["w_enc"], precision=_HI) + params["b_enc"]
    x_img_fc = jnp.dot(feat_img, params["w_fc"], precision=_HI) + params["b_fc"]  # dropout = id
    gap_vis = jnp.mean(x_vis.reshape(B, C_vis, T * Hv), axis=-1)
    x_vis_fc = jnp.dot(gap_vis, params["w_vis"], precision=_HI) + params["b_vis"]
    x_cat = jnp.concatenate([x_img_fc, x_vis_fc], axis=1)
    return jnp.dot(x_cat, params["w_cls"], precision=_HI) + params["b_cls"]


def init_params(key, c_img, c_vis):
    """Deterministic PyTorch-Linear-style uniform init for all weights."""
    ks = jax.random.split(key, 8)

    def lin(k, fan_in, shape):
        bound = 1.0 / (fan_in ** 0.5)
        return jax.random.uniform(k, shape, jnp.float32, -bound, bound)

    return dict(
        w_enc=lin(ks[0], c_img, (c_img, IMG_FEAT)),
        b_enc=lin(ks[1], c_img, (IMG_FEAT,)),
        w_fc=lin(ks[2], IMG_FEAT, (IMG_FEAT, FC_DIM)),       # nn.Linear(2048, 256)
        b_fc=lin(ks[3], IMG_FEAT, (FC_DIM,)),
        w_vis=lin(ks[4], c_vis, (c_vis, VIS_FEAT)),
        b_vis=lin(ks[5], c_vis, (VIS_FEAT,)),
        w_cls=lin(ks[6], FC_DIM + VIS_FEAT, (FC_DIM + VIS_FEAT, NUM_CLS)),  # nn.Linear(512, 9)
        b_cls=lin(ks[7], FC_DIM + VIS_FEAT, (NUM_CLS,)),
    )


if __name__ == "__main__":
    key = jax.random.PRNGKey(0)
    k_img, k_vis, k_par = jax.random.split(key, 3)

    # small, module-consistent shapes: RGB image + (7, 26, 24) visit tensor
    B, C_img, H, W = 2, 3, 16, 16
    C_vis, T, Hv = 7, 26, 24
    x_img = jax.random.normal(k_img, (B, C_img, H, W), jnp.float32)
    x_vis = jax.random.normal(k_vis, (B, C_vis, T, Hv), jnp.float32)

    params = init_params(k_par, C_img, C_vis)

    out = multimodal_forward(x_img, x_vis, params)
    jax.block_until_ready(out)
    assert out.shape == (B, NUM_CLS) and out.dtype == jnp.float32

    ref = multimodal_reference(x_img, x_vis, params)
    np.testing.assert_allclose(np.asarray(out), np.asarray(ref),
                               rtol=1e-2, atol=1e-2)
    print("KERNEL_OK")
</pallas_src>

<mosaic_0001>
module attributes {stable_mosaic.version = 11 : i64} {
  func.func @multimodal_kernel(%arg0: i32, %arg1: memref<2x3x256xf32, #tpu.memory_space<vmem>>, %arg2: memref<2x7x624xf32, #tpu.memory_space<vmem>>, %arg3: memref<3x128xf32, #tpu.memory_space<vmem>>, %arg4: memref<7x128xf32, #tpu.memory_space<vmem>>, %arg5: memref<1x128xf32, #tpu.memory_space<vmem>>, %arg6: memref<2x128xf32, #tpu.memory_space<vmem>>) attributes {dimension_semantics = [#tpu.dimension_semantics<parallel>], iteration_bounds = array<i64: 1>, scalar_prefetch = 0 : i64, scratch_operands = 0 : i64, tpu.core_type = #tpu.core_type<tc>, window_params = [{transform_indices = @transform_0, window_bounds = array<i64: 2, 3, 256>}, {transform_indices = @transform_1, window_bounds = array<i64: 2, 7, 624>}, {pipeline_mode = #tpu.pipeline_mode<synchronous>, transform_indices = @transform_2, window_bounds = array<i64: 3, 128>}, {pipeline_mode = #tpu.pipeline_mode<synchronous>, transform_indices = @transform_3, window_bounds = array<i64: 7, 128>}, {pipeline_mode = #tpu.pipeline_mode<synchronous>, transform_indices = @transform_4, window_bounds = array<i64: 1, 128>}, {transform_indices = @transform_5, window_bounds = array<i64: 2, 128>}]} {
    %c0 = arith.constant 0 : index
    %c0_0 = arith.constant 0 : index
    %c0_1 = arith.constant 0 : index
    %0 = vector.load %arg1[%c0, %c0_0, %c0_1] : memref<2x3x256xf32, #tpu.memory_space<vmem>>, vector<2x3x256xf32>
    %cst = arith.constant dense<0.000000e+00> : vector<2x3xf32>
    %1 = vector.multi_reduction <add>, %0, %cst [2] : vector<2x3x256xf32> to vector<2x3xf32>
    %cst_2 = arith.constant 3.906250e-03 : f32
    %2 = vector.broadcast %cst_2 : f32 to vector<2x3xf32>
    %3 = arith.mulf %1, %2 : vector<2x3xf32>
    %c0_3 = arith.constant 0 : index
    %c0_4 = arith.constant 0 : index
    %c0_5 = arith.constant 0 : index
    %4 = vector.load %arg2[%c0_3, %c0_4, %c0_5] : memref<2x7x624xf32, #tpu.memory_space<vmem>>, vector<2x7x624xf32>
    %cst_6 = arith.constant dense<0.000000e+00> : vector<2x7xf32>
    %5 = vector.multi_reduction <add>, %4, %cst_6 [2] : vector<2x7x624xf32> to vector<2x7xf32>
    %cst_7 = arith.constant 0.00160256412 : f32
    %6 = vector.broadcast %cst_7 : f32 to vector<2x7xf32>
    %7 = arith.mulf %5, %6 : vector<2x7xf32>
    %c0_8 = arith.constant 0 : index
    %c0_9 = arith.constant 0 : index
    %8 = vector.load %arg3[%c0_8, %c0_9] : memref<3x128xf32, #tpu.memory_space<vmem>>, vector<3x128xf32>
    %cst_10 = arith.constant dense<0.000000e+00> : vector<2x128xf32>
    %9 = tpu.matmul %3, %8, %cst_10 {dimension_numbers = #tpu.dot_dimension_numbers<[1], [0], [0], [1], [0, 0, 1, 1], [], []>} : vector<2x3xf32>, vector<3x128xf32>, vector<2x128xf32> -> vector<2x128xf32>
    %c0_11 = arith.constant 0 : index
    %c0_12 = arith.constant 0 : index
    %10 = vector.load %arg4[%c0_11, %c0_12] : memref<7x128xf32, #tpu.memory_space<vmem>>, vector<7x128xf32>
    %cst_13 = arith.constant dense<0.000000e+00> : vector<2x128xf32>
    %11 = tpu.matmul %7, %10, %cst_13 {dimension_numbers = #tpu.dot_dimension_numbers<[1], [0], [0], [1], [0, 0, 1, 1], [], []>} : vector<2x7xf32>, vector<7x128xf32>, vector<2x128xf32> -> vector<2x128xf32>
    %12 = arith.addf %9, %11 : vector<2x128xf32>
    %c0_14 = arith.constant 0 : index
    %c0_15 = arith.constant 0 : index
    %13 = vector.load %arg5[%c0_14, %c0_15] : memref<1x128xf32, #tpu.memory_space<vmem>>, vector<1x128xf32>
    %14 = vector.broadcast %13 : vector<1x128xf32> to vector<2x128xf32>
    %15 = arith.addf %12, %14 : vector<2x128xf32>
    %c0_16 = arith.constant 0 : index
    %c0_17 = arith.constant 0 : index
    %16 = vector.load %arg6[%c0_16, %c0_17] : memref<2x128xf32, #tpu.memory_space<vmem>>, vector<2x128xf32>
    tpu.vector_store %arg6[%c0_16, %c0_17], %15 {strides = array<i32>} : memref<2x128xf32, #tpu.memory_space<vmem>>, vector<2x128xf32>,
    return
  }
  func.func @transform_0(%arg0: i32) -> (i32, i32, i32) {
    %c0_i32 = arith.constant 0 : i32
    %c0_i32_0 = arith.constant 0 : i32
    %c0_i32_1 = arith.constant 0 : i32
    return %arg0, %c0_i32, %c0_i32_0 : i32, i32, i32
  }
  func.func @transform_1(%arg0: i32) -> (i32, i32, i32) {
    %c0_i32 = arith.constant 0 : i32
    %c0_i32_0 = arith.constant 0 : i32
    %c0_i32_1 = arith.constant 0 : i32
    return %arg0, %c0_i32, %c0_i32_0 : i32, i32, i32
  }
  func.func @transform_2(%arg0: i32) -> (i32, i32) {
    %c0_i32 = arith.constant 0 : i32
    %c0_i32_0 = arith.constant 0 : i32
    %c0_i32_1 = arith.constant 0 : i32
    return %c0_i32, %c0_i32_0 : i32, i32
  }
  func.func @transform_3(%arg0: i32) -> (i32, i32) {
    %c0_i32 = arith.constant 0 : i32
    %c0_i32_0 = arith.constant 0 : i32
    %c0_i32_1 = arith.constant 0 : i32
    return %c0_i32, %c0_i32_0 : i32, i32
  }
  func.func @transform_4(%arg0: i32) -> (i32, i32) {
    %c0_i32 = arith.constant 0 : i32
    %c0_i32_0 = arith.constant 0 : i32
    %c0_i32_1 = arith.constant 0 : i32
    return %c0_i32, %c0_i32_0 : i32, i32
  }
  func.func @transform_5(%arg0: i32) -> (i32, i32) {
    %c0_i32 = arith.constant 0 : i32
    %c0_i32_0 = arith.constant 0 : i32
    return %arg0, %c0_i32 : i32, i32
  }
}

</mosaic_0001>

<bundles_post_ra>
// kernel: tpu_custom_call.1
= control target key start
LH: loop header
LB: loop body
LE: loop exit
PB: predicated region body
PF: predicated region fallthrough
CT: control target
= control target key end

     0   :  { %vm29_vm0 = vcmask 1042432   ;;  %vm52_vm1 = vcmask 1046528   ;;  %vm60_vm2 = vcmask 915456   ;;  %s434_s0 = inlined_call_operand.vmem [shape: f32[2,3,256], index: 0, kind: input, shape index: {}]   ;;  %s435_s1 = inlined_call_operand.vmem [shape: f32[2,7,624], index: 1, kind: input, shape index: {}]   ;;  %s436_s2 = inlined_call_operand.vmem [shape: f32[3,128], index: 2, kind: input, shape index: {}]   ;;  %s437_s3 = inlined_call_operand.vmem [shape: f32[7,128], index: 3, kind: input, shape index: {}]   ;;  %s438_s4 = inlined_call_operand.vmem [shape: f32[1,128], index: 4, kind: input, shape index: {}]   ;;  %s439_s5 = inlined_call_operand.hbm [shape: f32[2,128], index: 5, kind: output, shape index: {}]  }
   0x1   :  { %v21_v0 = vld [vmem:[%s434_s0] sm:$0x77]  ;;  %v43_v4 = vld [vmem:[%s435_s1 + $0x8] sm:$0x7f]  ;;  %v44_v5 = vld [vmem:[%s435_s1 + $0x10] sm:$0x7f] }
   0x2   :  { %v42_v1 = vld [vmem:[%s435_s1] sm:$0x7f]  ;;  %v25_v2 = vcombine.high %v21_v0, %v21_v0  ;;  %v30_v3 = vsel %vm29_vm0, %v21_v0, 0.0  ;;  %v45_v7 = vld [vmem:[%s435_s1 + $0x18] sm:$0x7f]  ;;  %v54_v9 = vsel %vm52_vm1, %v43_v4, 0.0 }
   0x3   :  { %v53_v6 = vsel %vm52_vm1, %v42_v1, 0.0  ;;  %v46_v8 = vld [vmem:[%s435_s1 + $0x20] sm:$0x7f]  ;;  %v56_v10 = vsel %vm52_vm1, %v44_v5, 0.0  ;;  %v22_v13 = vld [vmem:[%s434_s0 + $0x8] sm:$0x77] }
   0x4   :  { %v31_v11 = vsel %vm29_vm0, %v25_v2, 0.0  ;;  %v55_v12 = vadd.f32 %v54_v9, %v53_v6  ;;  %v58_v15 = vsel %vm52_vm1, %v45_v7, 0.0  ;;  %v26_v16 = vcombine.high %v22_v13, %v22_v13  ;;  %v47_v18 = vld [vmem:[%s435_s1 + $0x28] sm:$0x7f]  ;;  %v48_v19 = vld [vmem:[%s435_s1 + $0x30] sm:$0x7f] }
   0x5   :  { %v32_v14 = vadd.f32 %v31_v11, %v30_v3  ;;  %v35_v17 = vsel %vm29_vm0, %v22_v13, 0.0  ;;  %v61_v21 = vsel %vm60_vm2, %v46_v8, 0.0  ;;  %v49_v22 = vld [vmem:[%s435_s1 + $0x38] sm:$0x7f]  ;;  %v50_v23 = vld [vmem:[%s435_s1 + $0x40] sm:$0x7f] }
   0x6   :  { %v57_v20 = vadd.f32 %v56_v10, %v55_v12  ;;  %v36_v24 = vsel %vm29_vm0, %v26_v16, 0.0  ;;  %v65_v25 = vsel %vm52_vm1, %v47_v18, 0.0  ;;  %v66_v26 = vsel %vm52_vm1, %v48_v19, 0.0 }
   0x7   :  { %33 = vadd.xlane.f32.xlu0 %v32_v14  ;;  %v68_v27 = vsel %vm52_vm1, %v49_v22, 0.0 }
   0x8   :  { %10 = vsyncpa [#allocation3], 0  ;;  %v59_v28 = vadd.f32 %v58_v15, %v57_v20  ;;  %v37_v29 = vadd.f32 %v36_v24, %v35_v17  ;;  %v51_v30 = vld [vmem:[%s435_s1 + $0x48] sm:$0x7f]  ;;  %v67_v31 = vadd.f32 %v66_v26, %v65_v25  ;;  %v70_v32 = vsel %vm52_vm1, %v50_v23, 0.0  ;;  %s330_s19 = smov [#allocation2]  }
   0x9   :  { %v72_v35 = vsel %vm60_vm2, %v51_v30, 0.0  ;;  %v328_v38 = vmov 0.0   ;;  %v78_v39 = vld [vmem:[%s436_s2] sm:$0x7]  ;;  %vm329_vm3 = vmmov 0   ;;  %v82_v41 = vlaneseq  ;;  %s272_s20 = sshll.u32 %s330_s19, 4  ;;  %s273_s20 = int_to_ptr.vmem [resolvable:$true] %s272_s20 }
   0xa   :  { %v62_v33 = vadd.f32 %v61_v21, %v59_v28  ;;  %v69_v34 = vadd.f32 %v68_v27, %v67_v31  ;;  %294 = vmatprep.subr.mxu1 %v328_v38  ;;  %289 = vmatprep.subr.mxu0 %v328_v38  ;;  %v79_v40 = vld [vmem:[%s437_s3] sm:$0x7f]  ;;  %vm92_vm4 = vcmask 1041409   ;;  %vm181_vm5 = vcmask 23552   ;;  %s304_s21 = scalar_lea.vmem %s273_s20, 32  ;;  %p309_p1 = scmp.lt.s32.totalorder %s273_s20, %s273_s20 }
   0xb   :  { %38 = vadd.xlane.f32.xlu0 %v37_v29  ;;  %295 = vmatpush3.msk.msra.mxu1 %vm29_vm0, %v78_v39  ;;  %v83_v42 = vand.u32 127, %v82_v41  ;;  %v85_v43 = vshrl.u32 %v82_v41, 7  ;;  %vm94_vm6 = vcmask 56320   ;;  %v284_v62 = vld [vmem:[%s438_s4] ss:$0 sm:$0xff]  ;;  %p305_p0 = scmp.ne.s32.totalorder %s273_s20, %s304_s21  ;;  %p310_p2 = scmp.lt.s32.totalorder %s304_s21, %s304_s21 }
   0xc   :  { %63 = vadd.xlane.f32.xlu1 %v62_v33  ;;  %v71_v36 = vadd.f32 %v70_v32, %v69_v34  ;;  %296 = vmatprep.mubr.msk.f32.mxu1 %vm329_vm3, %v328_v38 }
   0xd   :  { %291 = vmatprep.mubr.msk.f32.mxu0 %vm329_vm3, %v328_v38  ;;  %290 = vmatpush3.msk.msra.mxu0 %vm52_vm1, %v79_v40  ;;  %v86_v45 = vsub.s32 %v83_v42, %v85_v43  ;;  %p311_p3 = por %p310_p2, %p309_p1 }
   0xe   :  { %v73_v37 = vadd.f32 %v72_v35, %v71_v36 }
   0xf   :  { %p312_p4 = pnand %p311_p3, %p305_p0 }
  0x10   :  { %74 = vadd.xlane.f32.xlu1 %v73_v37 }
  0x94   :  { %v34_v44 = vpop.xlane.xlu0 %33 }
  0x95   :  { %v40_v46 = vmul.f32 0.00390625, %v34_v44 }
  0x97   :  { %v175_v48 = vrot.slane %v40_v46, %v86_v45 }
  0x98   :  { %v39_v47 = vpop.xlane.xlu0 %38 }
  0x99   :  { %v64_v49 = vpop.xlane.xlu1 %63  ;;  %v41_v50 = vmul.f32 0.00390625, %v39_v47 }
  0x9a   :  { %v76_v52 = vmul.f32 0.0016025641, %v64_v49 }
  0x9b   :  { %v179_v51 = vrot.slane %v41_v50, %v86_v45 }
  0x9c   :  { %v87_v56 = vrot.slane %v76_v52, %v86_v45 }
  0x9d   :  { %v75_v53 = vpop.xlane.xlu1 %74  ;;  %v180_v54 = vsel %vm92_vm4, %v179_v51, %v175_v48 }
  0x9e   :  { %v77_v55 = vmul.f32 0.0016025641, %v75_v53  ;;  %297 = vmatmul.mubr.msk.f32.vlgmr.msra.gmra.mrb[0].mxu1 %vm181_vm5, %v180_v54 }
  0xa0   :  { %v91_v57 = vrot.slane %v77_v55, %v86_v45 }
  0xa2   :  { %v93_v58 = vsel %vm92_vm4, %v91_v57, %v87_v56 }
  0xa3   :  { %292 = vmatmul.mubr.msk.f32.vlgmr.msra.gmra.mrb[0].mxu0 %vm94_vm6, %v93_v58 }
 0x171   :  { %v253_v59 = vpop.f32.mrb[0].mxu1 }
 0x172   :  { %v298_v60 = vpop.f32.mrb[1].mxu1 }
 0x176   :  { %v166_v61 = vpop.f32.mrb[0].mxu0 }
 0x177   :  { %v254_v63 = vadd.f32 %v253_v59, %v166_v61  ;;  %v293_v0 = vpop.f32.mrb[1].mxu0 }
 0x179   :  { %v264_v1 = vadd.f32 %v284_v62, %v254_v63 }
 0x17b   :  { %265 = vst [vmem:[#allocation2] sm:$0x3] %v264_v1 }
 0x17c   :  { %315 = shalt.err (!%p312_p4)
}
 0x17d   :  { %s316_s24 = scalar_lea.hbm %s439_s5, 32 }
 0x17e   :  { %p317_p5 = scmp.ne.s32.totalorder %s439_s5, %s316_s24  ;;  %p320_p6 = scmp.lt.u32.totalorder %s316_s24, %s439_s5 }
 0x180   :  { %p322_p7 = pnand %p320_p6, %p317_p5 }
 0x182   :  { %325 = shalt.err (!%p322_p7)
}
 0x183   :  { %275 = dma.vmem_to_hbm [thread:$0]  %s273_s20, 32, %s439_s5, [#allocation3]  }
 0x184   :  { %326 = dma.done.wait [#allocation3], 32  }
 0x185   :  { %327 = vsyncadd [#allocation3], 4294967264 }
 0x186   :  { %279 = vsyncpa [#allocation3], 1 }

</bundles_post_ra>
